<compile_context>
chip_gen: v7x
topology: tpu7x:2x2x1
jax: 0.10.0
libtpu: 0.0.40
codegen_flags: <defaults>
</compile_context>

<pallas_src>
import functools

import jax
import jax.numpy as jnp
from jax.experimental import pallas as pl
from jax.experimental.pallas import tpu as pltpu


_ROW_MAP = lambda i: (i, 0)      # row-tiled x / out
_C = lambda i: (0, 0)            # resident constants (1-D grid)


def _round_up(v, m):
    return (v + m - 1) // m * m


@functools.lru_cache(maxsize=1)
def _vmem_limit_bytes():
    """Generation-aware scoped-VMEM budget: ~75% of physical per-core VMEM,
    floor 32 MiB, cap 96 MiB (v5e/v6e: 128 MiB physical -> 96; v7x: 64 -> 48)."""
    cap = 64 * 1024 * 1024
    try:
        cap = int(pltpu.get_tpu_info().vmem_capacity_bytes)
    except Exception:
        pass
    return max(32 * 1024 * 1024, min(cap * 3 // 4, 96 * 1024 * 1024))


def _compiler_params(sem):
    return pltpu.CompilerParams(dimension_semantics=sem,
                                vmem_limit_bytes=_vmem_limit_bytes())


def _choose_block_rows(n, h):
    """~4 MiB of f32 per x tile (DMA-efficiency knee), multiple of 8 rows,
    capped at 8192, never larger than the (8-rounded) row count."""
    rows = ((4 * 1024 * 1024) // max(4 * h, 1)) // 8 * 8
    rows = max(8, min(rows, 8192))
    return min(rows, _round_up(max(n, 1), 8))


def _pick_tile(n, h, block_rows):
    tm = _round_up(block_rows, 8) if block_rows else _choose_block_rows(n, h)
    return min(tm, _round_up(max(n, 1), 8))


# ----------------------------- graphnorm kernels -----------------------------
def _gn_fast_kernel(x_ref, sc_ref, ec_ref, sr_ref, er_ref,
                    w_ref, b_ref, ms_ref, o_ref, *, num_rows):
    """Single-pass path: x fully VMEM-resident (one HBM read + one write)."""
    np8 = x_ref.shape[0]
    bsz = sc_ref.shape[0]
    rid = jax.lax.broadcasted_iota(jnp.int32, (np8, 1), 0)
    x = jnp.where(rid < num_rows, x_ref[...].astype(jnp.float32), 0.0)   # (N8, H)

    ids_bn = jax.lax.broadcasted_iota(jnp.int32, (bsz, np8), 1)
    mem_bn = ((ids_bn >= sc_ref[...]) & (ids_bn < ec_ref[...])).astype(jnp.float32)
    ids_nb = jax.lax.broadcasted_iota(jnp.int32, (np8, bsz), 0)
    mem_nb = ((ids_nb >= sr_ref[...]) & (ids_nb < er_ref[...])).astype(jnp.float32)

    cnt = jnp.maximum(jnp.sum(mem_bn, axis=-1, keepdims=True), 1.0)      # (B, 1)
    mean = jnp.dot(mem_bn, x, preferred_element_type=jnp.float32) / cnt  # (B, H)
    sub = x - jnp.dot(mem_nb, mean, preferred_element_type=jnp.float32) * ms_ref[...]
    m2 = jnp.dot(mem_bn, sub * sub, preferred_element_type=jnp.float32)  # (B, H)
    inv_std = jax.lax.rsqrt(m2 / cnt + 1e-6)
    o_ref[...] = (w_ref[...] * sub
                  * jnp.dot(mem_nb, inv_std, preferred_element_type=jnp.float32)
                  + b_ref[...]).astype(o_ref.dtype)


def _gn_stats_kernel(x_ref, sc_ref, ec_ref, sr_ref, er_ref,
                     cnt_ref, mean_ref, m2_ref,
                     *, block_rows, num_rows, tiles_per_core):
    """Per-core partial (count, mean, M2) over row tiles (Welford/Chan)."""
    c = pl.program_id(0)
    t = pl.program_id(1)

    @pl.when(t == 0)
    def _init():
        cnt_ref[...] = jnp.zeros_like(cnt_ref)
        mean_ref[...] = jnp.zeros_like(mean_ref)
        m2_ref[...] = jnp.zeros_like(m2_ref)

    row0 = (c * tiles_per_core + t) * block_rows
    bsz = sc_ref.shape[0]

    # Ragged / over-allocated tiles: zero OOB rows explicitly (Pallas pads them
    # with unspecified data and NaN * 0 would poison the reduction).
    rid = row0 + jax.lax.broadcasted_iota(jnp.int32, (block_rows, 1), 0)
    x = jnp.where(rid < num_rows, x_ref[...].astype(jnp.float32), 0.0)   # (TM, H)

    ids_bt = row0 + jax.lax.broadcasted_iota(jnp.int32, (bsz, block_rows), 1)
    mem_bt = ((ids_bt >= sc_ref[...]) & (ids_bt < ec_ref[...])).astype(jnp.float32)
    ids_tb = row0 + jax.lax.broadcasted_iota(jnp.int32, (block_rows, bsz), 0)
    mem_tb = ((ids_tb >= sr_ref[...]) & (ids_tb < er_ref[...])).astype(jnp.float32)

    cnt_t = jnp.sum(mem_bt, axis=-1, keepdims=True)                      # (B, 1)
    sum_t = jnp.dot(mem_bt, x, preferred_element_type=jnp.float32)       # (B, H)
    mean_t = sum_t / jnp.maximum(cnt_t, 1.0)
    # Stable subtract-then-square tile M2 (kept over E[x^2]-mean^2: this pass
    # is HBM-bound, so the extra matmul is hidden and we avoid cancellation).
    mean_n = jnp.dot(mem_tb, mean_t, preferred_element_type=jnp.float32)
    sub = x - mean_n
    m2_t = jnp.dot(mem_bt, sub * sub, preferred_element_type=jnp.float32)

    # Chan's combine with this core's running partials.
    n_a = cnt_ref[0]
    n_ab = n_a + cnt_t
    ratio = cnt_t / jnp.maximum(n_ab, 1.0)
    delta = mean_t - mean_ref[0]
    mean_ref[0] = mean_ref[0] + delta * ratio
    m2_ref[0] = m2_ref[0] + m2_t + delta * delta * (n_a * ratio)
    cnt_ref[0] = n_ab


def _gn_apply_kernel(x_ref, sr_ref, er_ref, ab_ref, o_ref, *, block_rows, hidden):
    """out = scale[g(node)] * x + shift[g(node)], one (TM,B)x(B,2H) matmul."""
    i = pl.program_id(0)
    x = x_ref[...].astype(jnp.float32)
    bsz = ab_ref.shape[0]
    ids_tb = i * block_rows + jax.lax.broadcasted_iota(jnp.int32, (block_rows, bsz), 0)
    mem_tb = ((ids_tb >= sr_ref[...]) & (ids_tb < er_ref[...])).astype(jnp.float32)
    coef = jnp.dot(mem_tb, ab_ref[...], preferred_element_type=jnp.float32)  # (TM, 2H)
    o_ref[...] = (coef[:, :hidden] * x + coef[:, hidden:]).astype(o_ref.dtype)


def graphnorm(x, batch_num_nodes, weight, bias, mean_scale, *, block_rows=None):
    n, h = x.shape
    bnn = jnp.asarray(batch_num_nodes, jnp.int32).reshape(-1)
    b = int(bnn.shape[0])
    ends = jnp.cumsum(bnn)
    starts = ends - bnn
    sc, ec = starts.reshape(b, 1), ends.reshape(b, 1)
    sr, er = starts.reshape(1, b), ends.reshape(1, b)
    w = weight.reshape(1, h).astype(jnp.float32)
    bb = bias.reshape(1, h).astype(jnp.float32)
    ms = mean_scale.reshape(1, h).astype(jnp.float32)

    vlim = _vmem_limit_bytes()
    np8 = _round_up(n, 8)
    fast_bytes = 7 * np8 * h * 4 + 3 * b * np8 * 4
    if block_rows is None and fast_bytes <= int(0.6 * vlim):
        return pl.pallas_call(
            functools.partial(_gn_fast_kernel, num_rows=n),
            grid=(1,),
            in_specs=[pl.BlockSpec((np8, h), _C),
                      pl.BlockSpec((b, 1), _C), pl.BlockSpec((b, 1), _C),
                      pl.BlockSpec((1, b), _C), pl.BlockSpec((1, b), _C),
                      pl.BlockSpec((1, h), _C), pl.BlockSpec((1, h), _C),
                      pl.BlockSpec((1, h), _C)],
            out_specs=pl.BlockSpec((np8, h), _C),
            out_shape=jax.ShapeDtypeStruct((n, h), x.dtype),
            compiler_params=_compiler_params(("arbitrary",)),
            cost_estimate=pl.CostEstimate(
                flops=int(8 * b * np8 * h + 8 * np8 * h),
                transcendentals=int(b * h),
                bytes_accessed=int(2 * n * h * 4)),
        )(x, sc, ec, sr, er, w, bb, ms)

    # --- two-pass tiled path (large x) ---
    tm = _pick_tile(n, h, block_rows)
    nblocks = pl.cdiv(n, tm)
    nc = 2 if nblocks >= 2 else 1               # split reduction over v7x's 2 TCs
    tpc = pl.cdiv(nblocks, nc)
    x_map = lambda c, t: (jnp.minimum(c * tpc + t, nblocks - 1), 0)
    c2 = lambda c, t: (0, 0)
    p_map = lambda c, t: (c, 0, 0)

    cnt_p, mean_p, m2_p = pl.pallas_call(
        functools.partial(_gn_stats_kernel, block_rows=tm, num_rows=n,
                          tiles_per_core=tpc),
        grid=(nc, tpc),
        in_specs=[pl.BlockSpec((tm, h), x_map),
                  pl.BlockSpec((b, 1), c2), pl.BlockSpec((b, 1), c2),
                  pl.BlockSpec((1, b), c2), pl.BlockSpec((1, b), c2)],
        out_specs=(pl.BlockSpec((1, b, 1), p_map),
                   pl.BlockSpec((1, b, h), p_map),
                   pl.BlockSpec((1, b, h), p_map)),
        out_shape=(jax.ShapeDtypeStruct((nc, b, 1), jnp.float32),
                   jax.ShapeDtypeStruct((nc, b, h), jnp.float32),
                   jax.ShapeDtypeStruct((nc, b, h), jnp.float32)),
        compiler_params=_compiler_params(("parallel", "arbitrary")),
        cost_estimate=pl.CostEstimate(
            flops=int(6 * b * n * h + 6 * n * h),
            transcendentals=0,
            bytes_accessed=int(n * h * 4 + 3 * nc * b * h * 4)),
    )(x, sc, ec, sr, er)

    # Cross-core Chan combine + fold weight/bias/mean_scale into per-graph
    # scale/shift (tiny B x H math; one fused XLA op).
    cnt = jnp.sum(cnt_p, axis=0)                                   # (B, 1)
    safe = jnp.maximum(cnt, 1.0)
    mean = jnp.sum(cnt_p * mean_p, axis=0) / safe                  # (B, H)
    m2 = jnp.sum(m2_p, axis=0) + jnp.sum(cnt_p * (mean_p - mean[None]) ** 2, axis=0)
    var = m2 / safe
    e_sub2 = var + (1.0 - ms) ** 2 * mean ** 2     # exact: E[(x - ms*mean)^2]
    scale = w * jax.lax.rsqrt(e_sub2 + 1e-6)
    shift = bb - scale * ms * mean
    ab = jnp.concatenate([scale, shift], axis=1)                   # (B, 2H)

    return pl.pallas_call(
        functools.partial(_gn_apply_kernel, block_rows=tm, hidden=h),
        grid=(nblocks,),
        in_specs=[pl.BlockSpec((tm, h), _ROW_MAP),
                  pl.BlockSpec((1, b), _C), pl.BlockSpec((1, b), _C),
                  pl.BlockSpec((b, 2 * h), _C)],
        out_specs=pl.BlockSpec((tm, h), _ROW_MAP),
        out_shape=jax.ShapeDtypeStruct((n, h), x.dtype),
        compiler_params=_compiler_params(("parallel",)),
        cost_estimate=pl.CostEstimate(
            flops=int(4 * b * n * h + 2 * n * h),
            transcendentals=0,
            bytes_accessed=int(2 * n * h * 4)),
    )(x, sr, er, ab)


# ----------------------------- layernorm kernel ------------------------------
def _layernorm_kernel(x_ref, w_ref, b_ref, o_ref):
    x = x_ref[...].astype(jnp.float32)
    mean = jnp.mean(x, axis=-1, keepdims=True)
    var = jnp.mean((x - mean) ** 2, axis=-1, keepdims=True)   # biased, eps 1e-5
    inv = jax.lax.rsqrt(var + 1e-5)
    o_ref[...] = ((x - mean) * inv * w_ref[...] + b_ref[...]).astype(o_ref.dtype)


def layernorm(x, weight, bias, *, block_rows=None):
    n, h = x.shape
    tm = _pick_tile(n, h, block_rows)
    nblocks = pl.cdiv(n, tm)
    return pl.pallas_call(
        _layernorm_kernel,
        grid=(nblocks,),
        in_specs=[pl.BlockSpec((tm, h), _ROW_MAP),
                  pl.BlockSpec((1, h), _C), pl.BlockSpec((1, h), _C)],
        out_specs=pl.BlockSpec((tm, h), _ROW_MAP),
        out_shape=jax.ShapeDtypeStruct((n, h), x.dtype),
        compiler_params=_compiler_params(("parallel",)),
        cost_estimate=pl.CostEstimate(
            flops=int(8 * n * h), transcendentals=int(n),
            bytes_accessed=int(2 * n * h * 4)),
    )(x, weight.reshape(1, h).astype(jnp.float32),
      bias.reshape(1, h).astype(jnp.float32))


# ------------------------ batchnorm (training) kernels ------------------------
def _bn_fast_kernel(x_ref, w_ref, b_ref, o_ref, *, num_rows):
    """Single-pass path: stats + apply with x fully VMEM-resident."""
    np8 = x_ref.shape[0]
    rid = jax.lax.broadcasted_iota(jnp.int32, (np8, 1), 0)
    x = jnp.where(rid < num_rows, x_ref[...].astype(jnp.float32), 0.0)
    inv_n = 1.0 / float(num_rows)
    mean = jnp.sum(x, axis=0, keepdims=True) * inv_n
    var = jnp.sum(x * x, axis=0, keepdims=True) * inv_n - mean * mean
    scale = w_ref[...] * jax.lax.rsqrt(var + 1e-5)
    shift = b_ref[...] - mean * scale
    o_ref[...] = (x * scale + shift).astype(o_ref.dtype)


def _bn_stats_kernel(x_ref, part_ref, *, block_rows, num_rows, tiles_per_core):
    """Per-core partial (sum, sum of squares) over row tiles."""
    c = pl.program_id(0)
    t = pl.program_id(1)

    @pl.when(t == 0)
    def _init():
        part_ref[...] = jnp.zeros_like(part_ref)

    row0 = (c * tiles_per_core + t) * block_rows
    rid = row0 + jax.lax.broadcasted_iota(jnp.int32, (block_rows, 1), 0)
    x = jnp.where(rid < num_rows, x_ref[...].astype(jnp.float32), 0.0)
    s = jnp.sum(x, axis=0, keepdims=True)
    sq = jnp.sum(x * x, axis=0, keepdims=True)
    part_ref[0] = part_ref[0] + jnp.concatenate([s, sq], axis=0)     # (2, H)


def _bn_apply_kernel(x_ref, st_ref, o_ref):
    x = x_ref[...].astype(jnp.float32)
    o_ref[...] = (x * st_ref[0:1, :] + st_ref[1:2, :]).astype(o_ref.dtype)


def batchnorm(x, weight, bias, *, block_rows=None):
    # TODO(synk): BatchNorm1d running-stats (momentum) tracking / eval mode are
    # stateful and not reproduced; this matches the training-mode forward.
    n, h = x.shape
    w = weight.reshape(1, h).astype(jnp.float32)
    bb = bias.reshape(1, h).astype(jnp.float32)
    vlim = _vmem_limit_bytes()
    np8 = _round_up(n, 8)

    if block_rows is None and 6 * np8 * h * 4 <= int(0.6 * vlim):
        return pl.pallas_call(
            functools.partial(_bn_fast_kernel, num_rows=n),
            grid=(1,),
            in_specs=[pl.BlockSpec((np8, h), _C),
                      pl.BlockSpec((1, h), _C), pl.BlockSpec((1, h), _C)],
            out_specs=pl.BlockSpec((np8, h), _C),
            out_shape=jax.ShapeDtypeStruct((n, h), x.dtype),
            compiler_params=_compiler_params(("arbitrary",)),
            cost_estimate=pl.CostEstimate(
                flops=int(6 * n * h), transcendentals=int(h),
                bytes_accessed=int(2 * n * h * 4)),
        )(x, w, bb)

    tm = _pick_tile(n, h, block_rows)
    nblocks = pl.cdiv(n, tm)
    nc = 2 if nblocks >= 2 else 1
    tpc = pl.cdiv(nblocks, nc)
    x_map = lambda c, t: (jnp.minimum(c * tpc + t, nblocks - 1), 0)
    p_map = lambda c, t: (c, 0, 0)

    parts = pl.pallas_call(
        functools.partial(_bn_stats_kernel, block_rows=tm, num_rows=n,
                          tiles_per_core=tpc),
        grid=(nc, tpc),
        in_specs=[pl.BlockSpec((tm, h), x_map)],
        out_specs=pl.BlockSpec((1, 2, h), p_map),
        out_shape=jax.ShapeDtypeStruct((nc, 2, h), jnp.float32),
        compiler_params=_compiler_params(("parallel", "arbitrary")),
        cost_estimate=pl.CostEstimate(
            flops=int(4 * n * h), transcendentals=0,
            bytes_accessed=int(n * h * 4)),
    )(x)

    tot = jnp.sum(parts, axis=0)                      # (2, H)
    mean = tot[0:1, :] / float(n)
    var = tot[1:2, :] / float(n) - mean * mean        # biased, eps 1e-5
    scale = w * jax.lax.rsqrt(var + 1e-5)
    shift = bb - mean * scale
    stats = jnp.concatenate([scale, shift], axis=0)   # (2, H)

    return pl.pallas_call(
        _bn_apply_kernel,
        grid=(nblocks,),
        in_specs=[pl.BlockSpec((tm, h), _ROW_MAP),
                  pl.BlockSpec((2, h), _C)],
        out_specs=pl.BlockSpec((tm, h), _ROW_MAP),
        out_shape=jax.ShapeDtypeStruct((n, h), x.dtype),
        compiler_params=_compiler_params(("parallel",)),
        cost_estimate=pl.CostEstimate(
            flops=int(2 * n * h), transcendentals=0,
            bytes_accessed=int(2 * n * h * 4)),
    )(x, stats)


# --------------------------------- wrapper ------------------------------------
class NormLayer:
    """JAX/Pallas port of graphmae NormLayer. Parameters match torch defaults
    (weight=ones, bias=zeros, mean_scale=ones) — deterministic init."""

    def __init__(self, hidden_dim, norm_type):
        if norm_type not in ("batchnorm", "layernorm", "graphnorm"):
            raise NotImplementedError
        self.norm_type = norm_type
        self.weight = jnp.ones((hidden_dim,), jnp.float32)
        self.bias = jnp.zeros((hidden_dim,), jnp.float32)
        if norm_type == "graphnorm":
            self.mean_scale = jnp.ones((hidden_dim,), jnp.float32)

    def __call__(self, graph, x, block_rows=None):
        if self.norm_type == "layernorm":
            return layernorm(x, self.weight, self.bias, block_rows=block_rows)
        if self.norm_type == "batchnorm":
            return batchnorm(x, self.weight, self.bias, block_rows=block_rows)
        bnn = graph["batch_num_nodes"] if isinstance(graph, dict) else graph.batch_num_nodes
        return graphnorm(x, bnn, self.weight, self.bias, self.mean_scale,
                         block_rows=block_rows)


# ------------------------------ pure-JAX refs ----------------------------------
def graphnorm_ref(x, bnn, w, b, ms):
    bsz = len(bnn)
    bl = jnp.asarray(bnn, jnp.float32)
    bidx = jnp.repeat(jnp.arange(bsz), jnp.asarray(bnn),
                      total_repeat_length=x.shape[0])
    seg_sum = jax.ops.segment_sum(x, bidx, num_segments=bsz)
    mean = seg_sum / bl[:, None]
    sub = x - mean[bidx] * ms
    seg_sq = jax.ops.segment_sum(sub ** 2, bidx, num_segments=bsz)
    std = jnp.sqrt(seg_sq / bl[:, None] + 1e-6)
    return w * sub / std[bidx] + b


def layernorm_ref(x, w, b):
    m = jnp.mean(x, -1, keepdims=True)
    v = jnp.mean((x - m) ** 2, -1, keepdims=True)
    return (x - m) * jax.lax.rsqrt(v + 1e-5) * w + b


def batchnorm_ref(x, w, b):
    m = jnp.mean(x, 0, keepdims=True)
    v = jnp.mean((x - m) ** 2, 0, keepdims=True)
    return (x - m) * jax.lax.rsqrt(v + 1e-5) * w + b


if __name__ == "__main__":
    key = jax.random.PRNGKey(0)
    hidden = 32
    batch_num_nodes = [3, 5, 9, 4]          # 4 graphs, 21 nodes total
    num_nodes = sum(batch_num_nodes)
    x = jax.random.normal(key, (num_nodes, hidden), dtype=jnp.float32)
    graph = {"batch_num_nodes": batch_num_nodes}

    # block_rows=8 forces the tiled two-pass / split-reduction path (3 row
    # tiles with a ragged tail); the default call takes the VMEM-resident
    # single-pass fast path.  Both are validated against the pure-JAX refs.
    TM = 8

    gn = NormLayer(hidden, "graphnorm")
    ref_gn = graphnorm_ref(x, batch_num_nodes, gn.weight, gn.bias, gn.mean_scale)
    out_gn_fast = jax.block_until_ready(gn(graph, x))
    out_gn_tiled = jax.block_until_ready(gn(graph, x, block_rows=TM))
    assert out_gn_fast.shape == x.shape and out_gn_tiled.shape == x.shape
    assert jnp.allclose(out_gn_fast, ref_gn, atol=1e-5, rtol=1e-4)
    assert jnp.allclose(out_gn_tiled, ref_gn, atol=1e-5, rtol=1e-4)

    ln = NormLayer(hidden, "layernorm")
    ref_ln = layernorm_ref(x, ln.weight, ln.bias)
    assert jnp.allclose(jax.block_until_ready(ln(graph, x)), ref_ln,
                        atol=1e-5, rtol=1e-5)
    assert jnp.allclose(jax.block_until_ready(ln(graph, x, block_rows=TM)), ref_ln,
                        atol=1e-5, rtol=1e-5)

    bn = NormLayer(hidden, "batchnorm")
    ref_bn = batchnorm_ref(x, bn.weight, bn.bias)
    assert jnp.allclose(jax.block_until_ready(bn(graph, x)), ref_bn,
                        atol=1e-5, rtol=1e-5)
    assert jnp.allclose(jax.block_until_ready(bn(graph, x, block_rows=TM)), ref_bn,
                        atol=1e-5, rtol=1e-5)

    print("KERNEL_OK")
</pallas_src>

<mosaic_0001>
module attributes {stable_mosaic.version = 11 : i64} {
  func.func @_gn_fast_kernel(%arg0: i32, %arg1: memref<24x32xf32, #tpu.memory_space<vmem>>, %arg2: memref<4x1xi32, #tpu.memory_space<vmem>>, %arg3: memref<4x1xi32, #tpu.memory_space<vmem>>, %arg4: memref<1x4xi32, #tpu.memory_space<vmem>>, %arg5: memref<1x4xi32, #tpu.memory_space<vmem>>, %arg6: memref<1x32xf32, #tpu.memory_space<vmem>>, %arg7: memref<1x32xf32, #tpu.memory_space<vmem>>, %arg8: memref<1x32xf32, #tpu.memory_space<vmem>>, %arg9: memref<24x32xf32, #tpu.memory_space<vmem>>) attributes {dimension_semantics = [#tpu.dimension_semantics<arbitrary>], iteration_bounds = array<i64: 1>, scalar_prefetch = 0 : i64, scratch_operands = 0 : i64, tpu.core_type = #tpu.core_type<tc>, window_params = [{transform_indices = @transform_0, window_bounds = array<i64: 24, 32>}, {pipeline_mode = #tpu.pipeline_mode<synchronous>, transform_indices = @transform_1, window_bounds = array<i64: 4, 1>}, {pipeline_mode = #tpu.pipeline_mode<synchronous>, transform_indices = @transform_2, window_bounds = array<i64: 4, 1>}, {pipeline_mode = #tpu.pipeline_mode<synchronous>, transform_indices = @transform_3, window_bounds = array<i64: 1, 4>}, {pipeline_mode = #tpu.pipeline_mode<synchronous>, transform_indices = @transform_4, window_bounds = array<i64: 1, 4>}, {pipeline_mode = #tpu.pipeline_mode<synchronous>, transform_indices = @transform_5, window_bounds = array<i64: 1, 32>}, {pipeline_mode = #tpu.pipeline_mode<synchronous>, transform_indices = @transform_6, window_bounds = array<i64: 1, 32>}, {pipeline_mode = #tpu.pipeline_mode<synchronous>, transform_indices = @transform_7, window_bounds = array<i64: 1, 32>}, {transform_indices = @transform_8, window_bounds = array<i64: 24, 32>}]} {
    %0 = tpu.iota {dimensions = array<i32: 0>} : vector<24x1xi32>
    %c21_i32 = arith.constant 21 : i32
    %1 = vector.broadcast %c21_i32 : i32 to vector<24x1xi32>
    %2 = arith.cmpi slt, %0, %1 : vector<24x1xi32>
    %c0 = arith.constant 0 : index
    %c0_0 = arith.constant 0 : index
    %3 = vector.load %arg1[%c0, %c0_0] : memref<24x32xf32, #tpu.memory_space<vmem>>, vector<24x32xf32>
    %cst = arith.constant 0.000000e+00 : f32
    %4 = vector.shape_cast %2 : vector<24x1xi1> to vector<24x1xi1>
    %5 = vector.broadcast %4 : vector<24x1xi1> to vector<24x32xi1>
    %6 = vector.broadcast %cst : f32 to vector<24x32xf32>
    %7 = arith.select %5, %3, %6 : vector<24x32xi1>, vector<24x32xf32>
    %8 = tpu.iota {dimensions = array<i32: 1>} : vector<4x24xi32>
    %c0_1 = arith.constant 0 : index
    %c0_2 = arith.constant 0 : index
    %9 = vector.load %arg2[%c0_1, %c0_2] : memref<4x1xi32, #tpu.memory_space<vmem>>, vector<4x1xi32>
    %10 = vector.broadcast %9 : vector<4x1xi32> to vector<4x24xi32>
    %11 = arith.cmpi sge, %8, %10 : vector<4x24xi32>
    %c0_3 = arith.constant 0 : index
    %c0_4 = arith.constant 0 : index
    %12 = vector.load %arg3[%c0_3, %c0_4] : memref<4x1xi32, #tpu.memory_space<vmem>>, vector<4x1xi32>
    %13 = vector.broadcast %12 : vector<4x1xi32> to vector<4x24xi32>
    %14 = arith.cmpi slt, %8, %13 : vector<4x24xi32>
    %15 = arith.andi %11, %14 : vector<4x24xi1>
    %16 = arith.extui %15 : vector<4x24xi1> to vector<4x24xi32>
    %17 = arith.sitofp %16 : vector<4x24xi32> to vector<4x24xf32>
    %18 = tpu.iota {dimensions = array<i32: 0>} : vector<24x4xi32>
    %c0_5 = arith.constant 0 : index
    %c0_6 = arith.constant 0 : index
    %19 = vector.load %arg4[%c0_5, %c0_6] : memref<1x4xi32, #tpu.memory_space<vmem>>, vector<1x4xi32>
    %20 = vector.broadcast %19 : vector<1x4xi32> to vector<24x4xi32>
    %21 = arith.cmpi sge, %18, %20 : vector<24x4xi32>
    %c0_7 = arith.constant 0 : index
    %c0_8 = arith.constant 0 : index
    %22 = vector.load %arg5[%c0_7, %c0_8] : memref<1x4xi32, #tpu.memory_space<vmem>>, vector<1x4xi32>
    %23 = vector.broadcast %22 : vector<1x4xi32> to vector<24x4xi32>
    %24 = arith.cmpi slt, %18, %23 : vector<24x4xi32>
    %25 = arith.andi %21, %24 : vector<24x4xi1>
    %26 = arith.extui %25 : vector<24x4xi1> to vector<24x4xi32>
    %27 = arith.sitofp %26 : vector<24x4xi32> to vector<24x4xf32>
    %cst_9 = arith.constant dense<0.000000e+00> : vector<4xf32>
    %28 = vector.multi_reduction <add>, %17, %cst_9 [1] : vector<4x24xf32> to vector<4xf32>
    %29 = vector.shape_cast %28 : vector<4xf32> to vector<4x1xf32>
    %cst_10 = arith.constant 1.000000e+00 : f32
    %30 = vector.broadcast %cst_10 : f32 to vector<4x1xf32>
    %31 = arith.maximumf %29, %30 : vector<4x1xf32>
    %cst_11 = arith.constant dense<0.000000e+00> : vector<4x32xf32>
    %32 = tpu.matmul %17, %7, %cst_11 {dimension_numbers = #tpu.dot_dimension_numbers<[1], [0], [0], [1], [0, 0, 1, 1], [], []>} : vector<4x24xf32>, vector<24x32xf32>, vector<4x32xf32> -> vector<4x32xf32>
    %33 = vector.broadcast %31 : vector<4x1xf32> to vector<4x32xf32>
    %34 = arith.divf %32, %33 : vector<4x32xf32>
    %cst_12 = arith.constant dense<0.000000e+00> : vector<24x32xf32>
    %35 = tpu.matmul %27, %34, %cst_12 {dimension_numbers = #tpu.dot_dimension_numbers<[1], [0], [0], [1], [0, 0, 1, 1], [], []>} : vector<24x4xf32>, vector<4x32xf32>, vector<24x32xf32> -> vector<24x32xf32>
    %c0_13 = arith.constant 0 : index
    %c0_14 = arith.constant 0 : index
    %36 = vector.load %arg8[%c0_13, %c0_14] : memref<1x32xf32, #tpu.memory_space<vmem>>, vector<1x32xf32>
    %37 = vector.broadcast %36 : vector<1x32xf32> to vector<24x32xf32>
    %38 = arith.mulf %35, %37 : vector<24x32xf32>
    %39 = arith.subf %7, %38 : vector<24x32xf32>
    %40 = arith.mulf %39, %39 : vector<24x32xf32>
    %cst_15 = arith.constant dense<0.000000e+00> : vector<4x32xf32>
    %41 = tpu.matmul %17, %40, %cst_15 {dimension_numbers = #tpu.dot_dimension_numbers<[1], [0], [0], [1], [0, 0, 1, 1], [], []>} : vector<4x24xf32>, vector<24x32xf32>, vector<4x32xf32> -> vector<4x32xf32>
    %42 = vector.broadcast %31 : vector<4x1xf32> to vector<4x32xf32>
    %43 = arith.divf %41, %42 : vector<4x32xf32>
    %cst_16 = arith.constant 9.99999997E-7 : f32
    %44 = vector.broadcast %cst_16 : f32 to vector<4x32xf32>
    %45 = arith.addf %43, %44 : vector<4x32xf32>
    %46 = math.rsqrt %45 : vector<4x32xf32>
    %c0_17 = arith.constant 0 : index
    %c0_18 = arith.constant 0 : index
    %47 = vector.load %arg6[%c0_17, %c0_18] : memref<1x32xf32, #tpu.memory_space<vmem>>, vector<1x32xf32>
    %48 = vector.broadcast %47 : vector<1x32xf32> to vector<24x32xf32>
    %49 = arith.mulf %48, %39 : vector<24x32xf32>
    %cst_19 = arith.constant dense<0.000000e+00> : vector<24x32xf32>
    %50 = tpu.matmul %27, %46, %cst_19 {dimension_numbers = #tpu.dot_dimension_numbers<[1], [0], [0], [1], [0, 0, 1, 1], [], []>} : vector<24x4xf32>, vector<4x32xf32>, vector<24x32xf32> -> vector<24x32xf32>
    %51 = arith.mulf %49, %50 : vector<24x32xf32>
    %c0_20 = arith.constant 0 : index
    %c0_21 = arith.constant 0 : index
    %52 = vector.load %arg7[%c0_20, %c0_21] : memref<1x32xf32, #tpu.memory_space<vmem>>, vector<1x32xf32>
    %53 = vector.broadcast %52 : vector<1x32xf32> to vector<24x32xf32>
    %54 = arith.addf %51, %53 : vector<24x32xf32>
    %c0_22 = arith.constant 0 : index
    %c0_23 = arith.constant 0 : index
    %55 = vector.load %arg9[%c0_22, %c0_23] : memref<24x32xf32, #tpu.memory_space<vmem>>, vector<24x32xf32>
    tpu.vector_store %arg9[%c0_22, %c0_23], %54 {strides = array<i32>} : memref<24x32xf32, #tpu.memory_space<vmem>>, vector<24x32xf32>,
    return
  }
  func.func @transform_0(%arg0: i32) -> (i32, i32) {
    %c0_i32 = arith.constant 0 : i32
    %c0_i32_0 = arith.constant 0 : i32
    %c0_i32_1 = arith.constant 0 : i32
    return %c0_i32, %c0_i32_0 : i32, i32
  }
  func.func @transform_1(%arg0: i32) -> (i32, i32) {
    %c0_i32 = arith.constant 0 : i32
    %c0_i32_0 = arith.constant 0 : i32
    %c0_i32_1 = arith.constant 0 : i32
    return %c0_i32, %c0_i32_0 : i32, i32
  }
  func.func @transform_2(%arg0: i32) -> (i32, i32) {
    %c0_i32 = arith.constant 0 : i32
    %c0_i32_0 = arith.constant 0 : i32
    %c0_i32_1 = arith.constant 0 : i32
    return %c0_i32, %c0_i32_0 : i32, i32
  }
  func.func @transform_3(%arg0: i32) -> (i32, i32) {
    %c0_i32 = arith.constant 0 : i32
    %c0_i32_0 = arith.constant 0 : i32
    %c0_i32_1 = arith.constant 0 : i32
    return %c0_i32, %c0_i32_0 : i32, i32
  }
  func.func @transform_4(%arg0: i32) -> (i32, i32) {
    %c0_i32 = arith.constant 0 : i32
    %c0_i32_0 = arith.constant 0 : i32
    %c0_i32_1 = arith.constant 0 : i32
    return %c0_i32, %c0_i32_0 : i32, i32
  }
  func.func @transform_5(%arg0: i32) -> (i32, i32) {
    %c0_i32 = arith.constant 0 : i32
    %c0_i32_0 = arith.constant 0 : i32
    %c0_i32_1 = arith.constant 0 : i32
    return %c0_i32, %c0_i32_0 : i32, i32
  }
  func.func @transform_6(%arg0: i32) -> (i32, i32) {
    %c0_i32 = arith.constant 0 : i32
    %c0_i32_0 = arith.constant 0 : i32
    %c0_i32_1 = arith.constant 0 : i32
    return %c0_i32, %c0_i32_0 : i32, i32
  }
  func.func @transform_7(%arg0: i32) -> (i32, i32) {
    %c0_i32 = arith.constant 0 : i32
    %c0_i32_0 = arith.constant 0 : i32
    %c0_i32_1 = arith.constant 0 : i32
    return %c0_i32, %c0_i32_0 : i32, i32
  }
  func.func @transform_8(%arg0: i32) -> (i32, i32) {
    %c0_i32 = arith.constant 0 : i32
    %c0_i32_0 = arith.constant 0 : i32
    %c0_i32_1 = arith.constant 0 : i32
    return %c0_i32, %c0_i32_0 : i32, i32
  }
}

</mosaic_0001>

<bundles_post_ra>
// kernel: tpu_custom_call.1
= control target key start
LH: loop header
LB: loop body
LE: loop exit
PB: predicated region body
PF: predicated region fallthrough
CT: control target
= control target key end

     0   :  { %13 = vsyncpa [#allocation3], 0  ;;  %s803_s0 = inlined_call_operand.hbm [shape: f32[21,32], index: 0, kind: input, shape index: {}]   ;;  %s804_s1 = inlined_call_operand.vmem [shape: s32[4,1], index: 1, kind: input, shape index: {}]   ;;  %s805_s2 = inlined_call_operand.vmem [shape: s32[4,1], index: 2, kind: input, shape index: {}]   ;;  %s806_s3 = inlined_call_operand.vmem [shape: s32[1,4], index: 3, kind: input, shape index: {}]   ;;  %s807_s4 = inlined_call_operand.vmem [shape: s32[1,4], index: 4, kind: input, shape index: {}]   ;;  %s808_s5 = inlined_call_operand.vmem [shape: f32[1,32], index: 5, kind: input, shape index: {}]   ;;  %s809_s6 = inlined_call_operand.vmem [shape: f32[1,32], index: 6, kind: input, shape index: {}]   ;;  %s810_s7 = inlined_call_operand.vmem [shape: f32[1,32], index: 7, kind: input, shape index: {}]   ;;  %s811_s8 = inlined_call_operand.hbm [shape: f32[21,32], index: 8, kind: output, shape index: {}]  }
   0x1   :  { %14 = vsyncpa [#allocation4], 0  ;;  %s639_s27 = smov [#allocation2]   ;;  %s591_s9 = scalar_lea.hbm %s803_s0, 384 }
   0x2   :  { %s20_s28 = sshll.u32 %s639_s27, 4  ;;  %p592_p0 = scmp.ne.s32.totalorder %s803_s0, %s591_s9  ;;  %s21_s28 = int_to_ptr.vmem [resolvable:$true] %s20_s28 }
   0x3   :  { %p595_p1 = scmp.lt.u32.totalorder %s591_s9, %s803_s0 }
   0x5   :  { %p597_p2 = pnand %p595_p1, %p592_p0 }
   0x7   :  { %600 = shalt.err (!%p597_p2)
}
   0x8   :  { %s601_s14 = scalar_lea.vmem %s21_s28, 384  ;;  %p606_p4 = scmp.lt.s32.totalorder %s21_s28, %s21_s28 }
   0x9   :  { %p602_p3 = scmp.ne.s32.totalorder %s21_s28, %s601_s14  ;;  %p607_p5 = scmp.lt.s32.totalorder %s601_s14, %s601_s14 }
   0xb   :  { %p608_p6 = por %p607_p5, %p606_p4 }
   0xd   :  { %p609_p7 = pnand %p608_p6, %p602_p3 }
   0xf   :  { %612 = shalt.err (!%p609_p7)
}
  0x10   :  { %s640_s15 = smov 128   ;;  %s641_s16 = smov 8  }
  0x11   :  { %26 = dma.hbm_to_vmem [thread:$0]  %s803_s0, 384, %s21_s28, [#allocation3], %s640_s15, %s640_s15, %s641_s16  }
  0x12   :  { %635 = dma.done.wait [#allocation3], 384  }
  0x13   :  { %636 = vsyncadd [#allocation3], 4294966912  ;;  %v642_v0 = vmov 0   ;;  %v44_v1 = vlaneseq  ;;  %v65_v2 = vld [vmem:[%s804_s1] sm:$0xf]  ;;  %v712_v5 = vld [vmem:[#allocation2 + $0x8] sm:$0xff] }
  0x14   :  { %586 = vset.pattern.permute.xlu0 %v642_v0  ;;  %v710_v4 = vld [vmem:[#allocation2] sm:$0xff]  ;;  %v643_v7 = vmov 0.0|0.0   ;;  %v644_v9 = vmov 0.0   ;;  %v724_v11 = vld [vmem:[#allocation2 + $0x10] sm:$0xff]  ;;  %vm645_vm1 = vmmov 0   ;;  %vm108_vm4 = vcmask 195584  }
  0x15   :  { %v45_v3 = vshrl.u32 %v44_v1, 7  ;;  %67 = vperm.xlu0 %586, %v65_v2   ;;  %v70_v6 = vld [vmem:[%s805_s2] sm:$0xf]  ;;  %570 = vmatprep.subr.bf16.mxu0 %v643_v7  ;;  %v571_v8 = vpack.c.bf16 %v712_v5, %v710_v4  ;;  %v64_v13 = vand.u32 127, %v44_v1  ;;  %vm103_vm5 = vcmask 191488  }
  0x16   :  { %576 = vmatprep.subr.mxu1 %v644_v9  ;;  %536 = vmatprep.mubr.msk.f32.mxu0 %vm645_vm1, %v644_v9  ;;  %v495_v19 = vld [vmem:[%s806_s3] ss:$0 sm:$0xff]  ;;  %vm194_vm15 = vcmask 1043456  }
  0x17   :  { %572 = vmatpush3.bf16.msra.mxu0 %v571_v8  ;;  %v720_v10 = vadd.s32 16, %v45_v3  ;;  %547 = vmatprep.mubr.msk.f32.mxu1 %vm645_vm1, %v644_v9  ;;  %v496_v20 = vld [vmem:[%s807_s4] ss:$0 sm:$0xff]  ;;  %vm83_vm7 = vcmp.ge.s32.totalorder %v45_v3, %v495_v19  ;;  %v46_v21 = vadd.s32 8, %v45_v3 }
  0x18   :  { %534 = vmatprep.subr.mxu0 %v644_v9  ;;  %vm91_vm8 = vcmp.lt.s32.totalorder %v45_v3, %v496_v20  ;;  %v506_v29 = vld [vmem:[%s810_s7] ss:$0 sm:$0xff] }
  0x19   :  { %72 = vperm.xlu0 %586, %v70_v6   ;;  %vm50_vm0 = vcmp.lt.s32.totalorder %v720_v10, 21  ;;  %vm85_vm9 = vcmp.ge.s32.totalorder %v720_v10, %v495_v19  ;;  %vm93_vm10 = vcmp.lt.s32.totalorder %v720_v10, %v496_v20  ;;  %vm94_vm11 = vmand %vm83_vm7, %vm91_vm8  ;;  %vm84_vm13 = vcmp.ge.s32.totalorder %v46_v21, %v495_v19  ;;  %v508_v52 = vld [vmem:[%s808_s5] ss:$0 sm:$0xff]  ;;  %s646_s5 = smov [#allocation5]  }
  0x1a   :  { %vm96_vm12 = vmand %vm85_vm9, %vm93_vm10  ;;  %vm92_vm14 = vcmp.lt.s32.totalorder %v46_v21, %v496_v20  ;;  %v497_v26 = vsel %vm94_vm11, 1.0, %v644_v9  ;;  %v62_v40 = vsel %vm50_vm0, %v724_v11, 0.0  ;;  %v513_v55 = vld [vmem:[%s809_s6] ss:$0 sm:$0xff]  ;;  %s482_s27 = sshll.u32 %s646_s5, 4  ;;  %s483_s27 = int_to_ptr.vmem [resolvable:$true] %s482_s27 }
  0x1b   :  { %535 = vmatpush3.msk.msra.mxu0 %vm50_vm0, %v724_v11  ;;  %v499_v27 = vsel %vm96_vm12, 1.0, %v644_v9  ;;  %vm473_vm0 = vcmask 261120   ;;  %s613_s6 = scalar_lea.vmem %s483_s27, 384  ;;  %p618_p9 = scmp.lt.s32.totalorder %s483_s27, %s483_s27 }
  0x1c   :  { %539 = vmatprep.subr.mxu0 %v644_v9  ;;  %p614_p8 = scmp.ne.s32.totalorder %s483_s27, %s613_s6  ;;  %p619_p10 = scmp.lt.s32.totalorder %s613_s6, %s613_s6 }
  0x1e   :  { %p620_p11 = por %p619_p10, %p618_p9 }
  0x20   :  { %p621_p12 = pnand %p620_p11, %p614_p8 }
  0x94   :  { %v68_v12 = vpop.permute.xlu0 %67 }
  0x95   :  { %vm69_vm2 = vcmp.ge.s32.totalorder %v64_v13, %v68_v12 }
  0x98   :  { %v73_v14 = vpop.permute.xlu0 %72 }
  0x99   :  { %vm74_vm3 = vcmp.lt.s32.totalorder %v64_v13, %v73_v14 }
  0x9a   :  { %vm75_vm6 = vmand %vm69_vm2, %vm74_vm3  ;;  %vm184_vm2 = vcmask 31744  }
  0x9b   :  { %v494_v15 = vsel %vm75_vm6, 1.0, %v644_v9  ;;  %vm95_vm3 = vmand %vm84_vm13, %vm92_vm14 }
  0x9c   :  { %537 = vmatmul.mubr.msk.f32.vlgmr.msra.gmra.mrb[0].mxu0 %vm108_vm4, %v494_v15  ;;  %v104_v16 = vsel %vm103_vm5, %v494_v15, 0.0  ;;  %v498_v28 = vsel %vm95_vm3, 1.0, %v644_v9 }
  0x9d   :  { %105 = vadd.xlane.f32.xlu1 %v104_v16  ;;  %541 = vmatprep.mubr.msk.f32.mxu0 %vm645_vm1, %v644_v9 }
 0x12a   :  { %v106_v17 = vpop.xlane.xlu1 %105 }
 0x12b   :  { %v107_v18 = vmax.f32 %v106_v17, 1.0 }
 0x12d   :  { %587 = vrcp.f32 %v107_v18 }
 0x137   :  { %v588_v22 = vpop.eup %587 }
 0x16f   :  { %v178_v23 = vpop.f32.mrb[0].mxu0 }
 0x170   :  { %v183_v24 = vmul.f32 %v588_v22, %v178_v23  ;;  %v538_v25 = vpop.f32.mrb[1].mxu0 }
 0x172   :  { %540 = vmatpush3.msk.msra.mxu0 %vm194_vm15, %v183_v24  ;;  %577 = vmatpush3.msk.msra.mxu1 %vm194_vm15, %v183_v24 }
 0x173   :  { %542 = vmatmul.mubr.msk.f32.vlgmr.msra.gmra.mrb[2].mxu0 %vm184_vm2, %v497_v26  ;;  %548 = vmatmul.mubr.msk.f32.vlgmr.msra.gmra.mrb[0].mxu1 %vm184_vm2, %v499_v27 }
 0x174   :  { %544 = vmatprep.mubr.msk.f32.mxu0 %vm645_vm1, %v644_v9  ;;  %573 = vmatprep.subr.bf16.mxu0 %v643_v7 }
 0x175   :  { %559 = vmatprep.subr.mxu1 %v644_v9  ;;  %561 = vmatprep.mubr.msk.f32.mxu1 %vm645_vm1, %v644_v9 }
 0x177   :  { %545 = vmatmul.mubr.msk.f32.gmra.mrb[4].mxu0 %vm184_vm2, %v498_v28 }
 0x178   :  { %556 = vmatprep.mubr.msk.f32.mxu0 %vm645_vm1, %v644_v9 }
 0x246   :  { %v264_v30 = vpop.f32.mrb[2].mxu0  ;;  %v274_v31 = vpop.f32.mrb[0].mxu1 }
 0x247   :  { %v285_v32 = vmul.f32 %v506_v29, %v264_v30  ;;  %v543_v33 = vpop.f32.mrb[3].mxu0  ;;  %v549_v34 = vpop.f32.mrb[1].mxu1  ;;  %v287_v39 = vmul.f32 %v506_v29, %v274_v31 }
 0x249   :  { %v288_v36 = vsub.f32 %v710_v4, %v285_v32  ;;  %v290_v44 = vsub.f32 %v62_v40, %v287_v39 }
 0x24a   :  { %v269_v35 = vpop.f32.mrb[4].mxu0 }
 0x24b   :  { %v286_v37 = vmul.f32 %v506_v29, %v269_v35  ;;  %v546_v38 = vpop.f32.mrb[5].mxu0  ;;  %v291_v42 = vmul.f32 %v288_v36, %v288_v36  ;;  %v293_v46 = vmul.f32 %v290_v44, %v290_v44  ;;  %v374_v53 = vmul.f32 %v508_v52, %v288_v36 }
 0x24c   :  { %v376_v0 = vmul.f32 %v508_v52, %v290_v44 }
 0x24d   :  { %v289_v41 = vsub.f32 %v712_v5, %v286_v37 }
 0x24f   :  { %v292_v43 = vmul.f32 %v289_v41, %v289_v41  ;;  %v375_v59 = vmul.f32 %v508_v52, %v289_v41 }
 0x251   :  { %v574_v45 = vpack.c.bf16 %v292_v43, %v291_v42 }
 0x253   :  { %575 = vmatpush3.bf16.msra.mxu0 %v574_v45 }
 0x254   :  { %554 = vmatprep.subr.mxu0 %v644_v9 }
 0x257   :  { %555 = vmatpush3.msra.mxu0 %v293_v46 }
 0x258   :  { %557 = vmatmul.mubr.msk.f32.vlgmr.msra.gmra.mrb[6].mxu0 %vm108_vm4, %v494_v15 }
 0x32b   :  { %v360_v47 = vpop.f32.mrb[6].mxu0 }
 0x32c   :  { %v364_v48 = vmul.f32 %v588_v22, %v360_v47  ;;  %v558_v49 = vpop.f32.mrb[7].mxu0 }
 0x32e   :  { %v365_v50 = vadd.f32 1e-06, %v364_v48 }
 0x330   :  { %589 = vrsqrt.f32 %v365_v50 }
 0x33a   :  { %v590_v51 = vpop.eup %589 }
 0x33b   :  { %560 = vmatpush3.msk.msra.mxu1 %vm194_vm15, %v590_v51 }
 0x33c   :  { %562 = vmatmul.mubr.msk.f32.vlgmr.msra.gmra.mrb[2].mxu1 %vm184_vm2, %v497_v26 }
 0x33d   :  { %564 = vmatprep.mubr.msk.f32.mxu1 %vm645_vm1, %v644_v9 }
 0x340   :  { %565 = vmatmul.mubr.msk.f32.gmra.mrb[4].mxu1 %vm184_vm2, %v498_v28 }
 0x341   :  { %567 = vmatprep.mubr.msk.f32.mxu1 %vm645_vm1, %v644_v9 }
 0x344   :  { %568 = vmatmul.mubr.msk.f32.gmra.mrb[6].mxu1 %vm184_vm2, %v499_v27 }
 0x40f   :  { %v446_v54 = vpop.f32.mrb[2].mxu1 }
 0x410   :  { %v460_v56 = vmul.f32 %v446_v54, %v374_v53  ;;  %v563_v57 = vpop.f32.mrb[3].mxu1 }
 0x412   :  { %v470_v58 = vadd.f32 %v513_v55, %v460_v56 }
 0x413   :  { %v451_v60 = vpop.f32.mrb[4].mxu1 }
 0x414   :  { %v461_v61 = vmul.f32 %v451_v60, %v375_v59  ;;  %v566_v62 = vpop.f32.mrb[5].mxu1  ;;  %474 = vst.msk [vmem:[#allocation5] sm:$0xff] %vm473_vm0, %v470_v58 }
 0x416   :  { %v471_v63 = vadd.f32 %v513_v55, %v461_v61 }
 0x417   :  { %v456_v1 = vpop.f32.mrb[6].mxu1 }
 0x418   :  { %v462_v2 = vmul.f32 %v456_v1, %v376_v0  ;;  %v569_v3 = vpop.f32.mrb[7].mxu1  ;;  %475 = vst.msk [vmem:[#allocation5 + $0x8] sm:$0xff] %vm473_vm0, %v471_v63 }
 0x41a   :  { %v472_v4 = vadd.f32 %v513_v55, %v462_v2 }
 0x41c   :  { %476 = vst.msk [vmem:[#allocation5 + $0x10] sm:$0xff] %vm473_vm0, %v472_v4 }
 0x41d   :  { %624 = shalt.err (!%p621_p12)
}
 0x41e   :  { %s625_s30 = scalar_lea.hbm %s811_s8, 384 }
 0x41f   :  { %p626_p13 = scmp.ne.s32.totalorder %s811_s8, %s625_s30  ;;  %p629_p0 = scmp.lt.u32.totalorder %s625_s30, %s811_s8 }
 0x421   :  { %p631_p1 = pnand %p629_p0, %p626_p13 }
 0x423   :  { %634 = shalt.err (!%p631_p1)
}
 0x424   :  { %488 = dma.vmem_to_hbm [thread:$0]  %s483_s27, 384, %s811_s8, [#allocation4], %s640_s15, %s640_s15, %s641_s16  }
 0x425   :  { %637 = dma.done.wait [#allocation4], 384  }
 0x426   :  { %638 = vsyncadd [#allocation4], 4294966912 }
 0x427   :  { %492 = vsyncpa [#allocation3], 1 }
 0x428   :  { %493 = vsyncpa [#allocation4], 1 }

</bundles_post_ra>
